<compile_context>
chip_gen: v6e
topology: v6e:2x2x1
jax: 0.10.0
libtpu: 0.0.40
codegen_flags: <defaults>
</compile_context>

<pallas_src>
import math

import jax
import jax.numpy as jnp
from jax.experimental import pallas as pl
from jax.experimental.pallas import tpu as pltpu

ENC_DIM = 128          # enc_dim in the PyTorch module
INPUT_SIZE = 12        # 3 (x) + 9 (flattened R)
OUT_SIZE = 6           # energy=False
OUT_PAD = 8            # padded output feature width (6 -> 8)
SIGMA = 0.5
LOG_SIGMA = math.log(SIGMA)
TWO_PI = 2.0 * math.pi


def _round_up(n, m):
    return ((n + m - 1) // m) * m


def _silu(x):
    # x * sigmoid(x) == x * 0.5 * (1 + tanh(x/2)): one EUP op per element.
    return x * (0.5 + 0.5 * jnp.tanh(0.5 * x))


def se3dif_kernel(
    xr_ref,    # (TB, 12)  cat(x, R.reshape(-1,9))            f32
    k_ref,     # (TB, 1)   diffusion time                     f32
    wx_ref,    # (12, 128) x_embed Linear weight              bf16
    bx_ref,    # (1, 128)                                     f32
    wf_ref,    # (1, 128)  [Wf, Wf] * 2*pi (pre-scaled)       f32
    ph_ref,    # (1, 128)  phase offsets [0.., pi/2..]        f32
    wt_ref,    # (128,128) time_embed Linear weight           bf16
    bt_ref,    # (1, 128)                                     f32
    wn1_ref,   # (256,128) network Linear(256,128), fused     bf16
    bn1_ref,   # (1, 128)                                     f32
    wn2_ref,   # (128,256) network Linear(128,256)            bf16
    bn2_ref,   # (1, 256)                                     f32
    wn3_ref,   # (256,128) network Linear(256,6) zero-padded  bf16
    bn3_ref,   # (1, 128)  zero-padded bias                   f32
    out_ref,   # (TB, 8)   only [:, :6] is meaningful
):
    k = k_ref[...]                                            # (TB,1) f32

    # ---- x_embed: Linear(12, 128) + SiLU (single fused K=12 matmul) ----
    z = (jnp.dot(xr_ref[...].astype(jnp.bfloat16), wx_ref[...],
                 preferred_element_type=jnp.float32) + bx_ref[...])
    z = _silu(z)

    # ---- time_embed: Fourier features via phase offset + Linear(128,128) + SiLU
    # cat(sin(2pi k W), cos(2pi k W)) == sin(k*[2piW,2piW] + [0..,pi/2..])
    ff = jnp.sin(k * wf_ref[...] + ph_ref[...]).astype(jnp.bfloat16)   # (TB,128)
    zt = (jnp.dot(ff, wt_ref[...], preferred_element_type=jnp.float32)
          + bt_ref[...])
    zt = _silu(zt)

    # ---- network: Linear(256,128) ReLU, Linear(128,256) ReLU, Linear(256,6) ----
    # Concat of two 128-lane arrays is vreg-aligned (no cross-lane shuffle);
    # single K=256 matmul fills the 256-deep MXU on v6e/v7x.
    zc = jnp.concatenate([z, zt], axis=-1).astype(jnp.bfloat16)        # (TB,256)
    h = jnp.dot(zc, wn1_ref[...], preferred_element_type=jnp.float32) + bn1_ref[...]
    h = jnp.maximum(h, 0.0).astype(jnp.bfloat16)     # fused bias+ReLU+cast
    h = jnp.dot(h, wn2_ref[...], preferred_element_type=jnp.float32) + bn2_ref[...]
    h = jnp.maximum(h, 0.0).astype(jnp.bfloat16)
    v = jnp.dot(h, wn3_ref[...], preferred_element_type=jnp.float32) + bn3_ref[...]

    # ---- divide by std(k)^2 = (sigma^(2k) - 1) / (2 ln sigma) ----
    # Exact divide: var -> 0 as k -> 0, so the approx reciprocal is avoided here.
    var = (jnp.exp((2.0 * LOG_SIGMA) * k) - 1.0) * (1.0 / (2.0 * LOG_SIGMA))  # (TB,1)
    out_ref[...] = v[:, :OUT_PAD] / var


def naive_se3_diffusion_forward(x, R, k, params, *, block_b=2048):
    """x: (B,3) f32, R: (B,3,3) f32, k: (B,) f32  ->  (B,6) f32."""
    B = x.shape[0]
    # Cap the tile so the grid has >=2 "parallel" steps when possible
    # (dual-TensorCore sharding on v7x); keep it a multiple of 8 sublanes.
    TB = min(block_b, max(8, _round_up(-(-B // 2), 8)))
    Bp = _round_up(B, TB)

    xr = jnp.concatenate(
        [x.astype(jnp.float32), R.reshape(B, 9).astype(jnp.float32)], axis=-1)
    k2 = k.reshape(B, 1).astype(jnp.float32)
    if Bp != B:
        pad = Bp - B
        xr = jnp.pad(xr, ((0, pad), (0, 0)))
        # pad k with 1.0 so var(k) != 0 in the discarded padded rows
        k2 = jnp.pad(k2, ((0, pad), (0, 0)), constant_values=1.0)

    inputs = (
        xr, k2,
        params["Wx"], params["bx"],
        params["Wf_full"], params["phase"],
        params["Wt"], params["bt"],
        params["Wn1"], params["bn1"],
        params["Wn2"], params["bn2"],
        params["Wn3"], params["bn3"],
    )

    def act_spec(feat):
        return pl.BlockSpec((TB, feat), lambda i: (i, 0))

    def w_spec(a):
        return pl.BlockSpec(a.shape, lambda i: (0, 0))

    in_specs = [act_spec(INPUT_SIZE), act_spec(1)]
    in_specs += [w_spec(a) for a in inputs[2:]]

    out = pl.pallas_call(
        se3dif_kernel,
        out_shape=jax.ShapeDtypeStruct((Bp, OUT_PAD), jnp.float32),
        grid=(Bp // TB,),
        in_specs=in_specs,
        out_specs=pl.BlockSpec((TB, OUT_PAD), lambda i: (i, 0)),
        compiler_params=pltpu.CompilerParams(
            dimension_semantics=("parallel",),
            vmem_limit_bytes=32 * 1024 * 1024,
        ),
    )(*inputs)

    # TODO(synk): in production, fuse this slice into the consumer instead of a
    # separate XLA pass over the (Bp, 8) output.
    return out[:B, :OUT_SIZE]


def init_params(key):
    """Deterministic synthetic parameters with the module's shapes.

    PyTorch nn.Linear stores weight as (out, in); here stored as (in, out).
    Matmul weights live in bf16 (MXU-native); biases / Fourier features in f32.
    2*pi is folded into the Fourier weight, and sin/cos are realized via a
    phase-offset vector. The final layer is zero-padded 6 -> 128 columns for a
    clean MXU tile; only the first 8 lanes are stored."""
    ks = jax.random.split(key, 12)
    bf16 = jnp.bfloat16
    p = {}
    # GaussianFourierProjection: W ~ randn(embed_dim // 2) * 30
    Wf = jax.random.normal(ks[0], (1, ENC_DIM // 2), dtype=jnp.float32) * 30.0
    p["Wf_raw"] = Wf                                           # for the reference
    p["Wf_full"] = jnp.concatenate([Wf, Wf], axis=-1) * TWO_PI  # (1,128)
    p["phase"] = jnp.concatenate(
        [jnp.zeros((1, ENC_DIM // 2), jnp.float32),
         jnp.full((1, ENC_DIM // 2), 0.5 * math.pi, jnp.float32)], axis=-1)
    # x_embed: Linear(12, 128)
    p["Wx"] = (jax.random.normal(ks[1], (INPUT_SIZE, ENC_DIM)) * 0.1).astype(bf16)
    p["bx"] = (jax.random.normal(ks[2], (1, ENC_DIM)) * 0.1).astype(jnp.float32)
    # time_embed: Linear(128, 128)
    p["Wt"] = (jax.random.normal(ks[3], (ENC_DIM, ENC_DIM)) * 0.1).astype(bf16)
    p["bt"] = (jax.random.normal(ks[4], (1, ENC_DIM)) * 0.1).astype(jnp.float32)
    # network[0]: Linear(256, 128) (fused z || z_time contraction)
    p["Wn1"] = (jax.random.normal(ks[5], (2 * ENC_DIM, 128)) * 0.1).astype(bf16)
    p["bn1"] = (jax.random.normal(ks[6], (1, 128)) * 0.1).astype(jnp.float32)
    # network[2]: Linear(128, 256)
    p["Wn2"] = (jax.random.normal(ks[7], (128, 256)) * 0.1).astype(bf16)
    p["bn2"] = (jax.random.normal(ks[8], (1, 256)) * 0.1).astype(jnp.float32)
    # network[4]: Linear(256, 6), zero-padded to 128 output columns
    Wn3 = jax.random.normal(ks[9], (256, OUT_SIZE), dtype=jnp.float32) * 0.1
    p["Wn3"] = (jnp.zeros((256, 128), jnp.float32)
                .at[:, :OUT_SIZE].set(Wn3)).astype(bf16)
    bn3 = jax.random.normal(ks[10], (1, OUT_SIZE), dtype=jnp.float32) * 0.1
    p["bn3"] = jnp.zeros((1, 128), jnp.float32).at[:, :OUT_SIZE].set(bn3)
    return p


def reference_forward(x, R, k, p):
    """Pure-JAX f32 reference mirroring the PyTorch module (same weight values)."""
    f32 = lambda a: a.astype(jnp.float32)
    B = x.shape[0]
    xr = jnp.concatenate([x, R.reshape(B, -1)], axis=-1)
    z = jax.nn.silu(xr @ f32(p["Wx"]) + p["bx"])
    proj = k[:, None] * p["Wf_raw"] * TWO_PI
    ff = jnp.concatenate([jnp.sin(proj), jnp.cos(proj)], axis=-1)
    zt = jax.nn.silu(ff @ f32(p["Wt"]) + p["bt"])
    z_in = jnp.concatenate([z, zt], axis=-1)
    h = jax.nn.relu(z_in @ f32(p["Wn1"]) + p["bn1"])
    h = jax.nn.relu(h @ f32(p["Wn2"]) + p["bn2"])
    v = h @ f32(p["Wn3"])[:, :OUT_SIZE] + p["bn3"][:, :OUT_SIZE]
    std = jnp.sqrt((SIGMA ** (2.0 * k) - 1.0) / (2.0 * LOG_SIGMA))
    return v / (std[:, None] ** 2)


def _check(out, ref, tag):
    # bf16 matmul operands: compare with a normalized max-error metric rather
    # than a per-element atol near zero.
    rel = float(jnp.max(jnp.abs(out - ref)) / (jnp.max(jnp.abs(ref)) + 1e-6))
    assert rel < 3e-2, f"{tag}: relative error too high: {rel}"


if __name__ == "__main__":
    key = jax.random.PRNGKey(0)
    kp, kx, kR, kk = jax.random.split(key, 4)

    params = init_params(kp)

    # Case 1: default tiling -> 2 grid steps (TB = 16, Bp = 32).
    B1 = 32
    x1 = jax.random.normal(kx, (B1, 3), dtype=jnp.float32)
    R1 = jax.random.normal(kR, (B1, 3, 3), dtype=jnp.float32)
    k1 = jax.random.uniform(kk, (B1,), dtype=jnp.float32, minval=0.05, maxval=1.0)
    out1 = jax.block_until_ready(naive_se3_diffusion_forward(x1, R1, k1, params))
    assert out1.shape == (B1, OUT_SIZE)
    _check(out1, reference_forward(x1, R1, k1, params), "default-tile")

    # Case 2: multi-tile grid with a padded (non-multiple) batch tail.
    B2 = 13
    out2 = jax.block_until_ready(
        naive_se3_diffusion_forward(x1[:B2], R1[:B2], k1[:B2], params, block_b=8))
    assert out2.shape == (B2, OUT_SIZE)
    _check(out2, reference_forward(x1[:B2], R1[:B2], k1[:B2], params), "multi-tile")

    print("KERNEL_OK")
</pallas_src>

<mosaic_0001>
module attributes {stable_mosaic.version = 11 : i64} {
  func.func @se3dif_kernel(%arg0: i32, %arg1: memref<16x12xf32, #tpu.memory_space<vmem>>, %arg2: memref<16x1xf32, #tpu.memory_space<vmem>>, %arg3: memref<12x128xbf16, #tpu.memory_space<vmem>>, %arg4: memref<1x128xf32, #tpu.memory_space<vmem>>, %arg5: memref<1x128xf32, #tpu.memory_space<vmem>>, %arg6: memref<1x128xf32, #tpu.memory_space<vmem>>, %arg7: memref<128x128xbf16, #tpu.memory_space<vmem>>, %arg8: memref<1x128xf32, #tpu.memory_space<vmem>>, %arg9: memref<256x128xbf16, #tpu.memory_space<vmem>>, %arg10: memref<1x128xf32, #tpu.memory_space<vmem>>, %arg11: memref<128x256xbf16, #tpu.memory_space<vmem>>, %arg12: memref<1x256xf32, #tpu.memory_space<vmem>>, %arg13: memref<256x128xbf16, #tpu.memory_space<vmem>>, %arg14: memref<1x128xf32, #tpu.memory_space<vmem>>, %arg15: memref<16x8xf32, #tpu.memory_space<vmem>>) attributes {dimension_semantics = [#tpu.dimension_semantics<parallel>], iteration_bounds = array<i64: 2>, scalar_prefetch = 0 : i64, scratch_operands = 0 : i64, tpu.core_type = #tpu.core_type<tc>, window_params = [{transform_indices = @transform_0, window_bounds = array<i64: 16, 12>}, {transform_indices = @transform_1, window_bounds = array<i64: 16, 1>}, {pipeline_mode = #tpu.pipeline_mode<synchronous>, transform_indices = @transform_2, window_bounds = array<i64: 12, 128>}, {pipeline_mode = #tpu.pipeline_mode<synchronous>, transform_indices = @transform_3, window_bounds = array<i64: 1, 128>}, {pipeline_mode = #tpu.pipeline_mode<synchronous>, transform_indices = @transform_4, window_bounds = array<i64: 1, 128>}, {pipeline_mode = #tpu.pipeline_mode<synchronous>, transform_indices = @transform_5, window_bounds = array<i64: 1, 128>}, {pipeline_mode = #tpu.pipeline_mode<synchronous>, transform_indices = @transform_6, window_bounds = array<i64: 128, 128>}, {pipeline_mode = #tpu.pipeline_mode<synchronous>, transform_indices = @transform_7, window_bounds = array<i64: 1, 128>}, {pipeline_mode = #tpu.pipeline_mode<synchronous>, transform_indices = @transform_8, window_bounds = array<i64: 256, 128>}, {pipeline_mode = #tpu.pipeline_mode<synchronous>, transform_indices = @transform_9, window_bounds = array<i64: 1, 128>}, {pipeline_mode = #tpu.pipeline_mode<synchronous>, transform_indices = @transform_10, window_bounds = array<i64: 128, 256>}, {pipeline_mode = #tpu.pipeline_mode<synchronous>, transform_indices = @transform_11, window_bounds = array<i64: 1, 256>}, {pipeline_mode = #tpu.pipeline_mode<synchronous>, transform_indices = @transform_12, window_bounds = array<i64: 256, 128>}, {pipeline_mode = #tpu.pipeline_mode<synchronous>, transform_indices = @transform_13, window_bounds = array<i64: 1, 128>}, {transform_indices = @transform_14, window_bounds = array<i64: 16, 8>}]} {
    %c0 = arith.constant 0 : index
    %c0_0 = arith.constant 0 : index
    %0 = vector.load %arg2[%c0, %c0_0] : memref<16x1xf32, #tpu.memory_space<vmem>>, vector<16x1xf32>
    %c0_1 = arith.constant 0 : index
    %c0_2 = arith.constant 0 : index
    %1 = vector.load %arg1[%c0_1, %c0_2] : memref<16x12xf32, #tpu.memory_space<vmem>>, vector<16x12xf32>
    %2 = arith.truncf %1 : vector<16x12xf32> to vector<16x12xbf16>
    %c0_3 = arith.constant 0 : index
    %c0_4 = arith.constant 0 : index
    %3 = vector.load %arg3[%c0_3, %c0_4] : memref<12x128xbf16, #tpu.memory_space<vmem>>, vector<12x128xbf16>
    %cst = arith.constant dense<0.000000e+00> : vector<16x128xf32>
    %4 = tpu.matmul %2, %3, %cst {dimension_numbers = #tpu.dot_dimension_numbers<[1], [0], [0], [1], [0, 0, 1, 1], [], []>} : vector<16x12xbf16>, vector<12x128xbf16>, vector<16x128xf32> -> vector<16x128xf32>
    %c0_5 = arith.constant 0 : index
    %c0_6 = arith.constant 0 : index
    %5 = vector.load %arg4[%c0_5, %c0_6] : memref<1x128xf32, #tpu.memory_space<vmem>>, vector<1x128xf32>
    %6 = vector.broadcast %5 : vector<1x128xf32> to vector<16x128xf32>
    %7 = arith.addf %4, %6 : vector<16x128xf32>
    %cst_7 = arith.constant 5.000000e-01 : f32
    %8 = vector.broadcast %cst_7 : f32 to vector<16x128xf32>
    %9 = arith.mulf %8, %7 : vector<16x128xf32>
    %10 = math.tanh %9 : vector<16x128xf32>
    %cst_8 = arith.constant 5.000000e-01 : f32
    %11 = vector.broadcast %cst_8 : f32 to vector<16x128xf32>
    %12 = arith.mulf %11, %10 : vector<16x128xf32>
    %cst_9 = arith.constant 5.000000e-01 : f32
    %13 = vector.broadcast %cst_9 : f32 to vector<16x128xf32>
    %14 = arith.addf %13, %12 : vector<16x128xf32>
    %15 = arith.mulf %7, %14 : vector<16x128xf32>
    %c0_10 = arith.constant 0 : index
    %c0_11 = arith.constant 0 : index
    %16 = vector.load %arg5[%c0_10, %c0_11] : memref<1x128xf32, #tpu.memory_space<vmem>>, vector<1x128xf32>
    %17 = vector.broadcast %0 : vector<16x1xf32> to vector<16x128xf32>
    %18 = vector.broadcast %16 : vector<1x128xf32> to vector<16x128xf32>
    %19 = arith.mulf %17, %18 : vector<16x128xf32>
    %c0_12 = arith.constant 0 : index
    %c0_13 = arith.constant 0 : index
    %20 = vector.load %arg6[%c0_12, %c0_13] : memref<1x128xf32, #tpu.memory_space<vmem>>, vector<1x128xf32>
    %21 = vector.broadcast %20 : vector<1x128xf32> to vector<16x128xf32>
    %22 = arith.addf %19, %21 : vector<16x128xf32>
    %23 = math.sin %22 : vector<16x128xf32>
    %24 = arith.truncf %23 : vector<16x128xf32> to vector<16x128xbf16>
    %c0_14 = arith.constant 0 : index
    %c0_15 = arith.constant 0 : index
    %25 = vector.load %arg7[%c0_14, %c0_15] : memref<128x128xbf16, #tpu.memory_space<vmem>>, vector<128x128xbf16>
    %cst_16 = arith.constant dense<0.000000e+00> : vector<16x128xf32>
    %26 = tpu.matmul %24, %25, %cst_16 {dimension_numbers = #tpu.dot_dimension_numbers<[1], [0], [0], [1], [0, 0, 1, 1], [], []>} : vector<16x128xbf16>, vector<128x128xbf16>, vector<16x128xf32> -> vector<16x128xf32>
    %c0_17 = arith.constant 0 : index
    %c0_18 = arith.constant 0 : index
    %27 = vector.load %arg8[%c0_17, %c0_18] : memref<1x128xf32, #tpu.memory_space<vmem>>, vector<1x128xf32>
    %28 = vector.broadcast %27 : vector<1x128xf32> to vector<16x128xf32>
    %29 = arith.addf %26, %28 : vector<16x128xf32>
    %cst_19 = arith.constant 5.000000e-01 : f32
    %30 = vector.broadcast %cst_19 : f32 to vector<16x128xf32>
    %31 = arith.mulf %30, %29 : vector<16x128xf32>
    %32 = math.tanh %31 : vector<16x128xf32>
    %cst_20 = arith.constant 5.000000e-01 : f32
    %33 = vector.broadcast %cst_20 : f32 to vector<16x128xf32>
    %34 = arith.mulf %33, %32 : vector<16x128xf32>
    %cst_21 = arith.constant 5.000000e-01 : f32
    %35 = vector.broadcast %cst_21 : f32 to vector<16x128xf32>
    %36 = arith.addf %35, %34 : vector<16x128xf32>
    %37 = arith.mulf %29, %36 : vector<16x128xf32>
    %38 = tpu.concatenate %15, %37 in 1 : vector<16x128xf32>, vector<16x128xf32> -> vector<16x256xf32>
    %39 = arith.truncf %38 : vector<16x256xf32> to vector<16x256xbf16>
    %c0_22 = arith.constant 0 : index
    %c0_23 = arith.constant 0 : index
    %40 = vector.load %arg9[%c0_22, %c0_23] : memref<256x128xbf16, #tpu.memory_space<vmem>>, vector<256x128xbf16>
    %cst_24 = arith.constant dense<0.000000e+00> : vector<16x128xf32>
    %41 = tpu.matmul %39, %40, %cst_24 {dimension_numbers = #tpu.dot_dimension_numbers<[1], [0], [0], [1], [0, 0, 1, 1], [], []>} : vector<16x256xbf16>, vector<256x128xbf16>, vector<16x128xf32> -> vector<16x128xf32>
    %c0_25 = arith.constant 0 : index
    %c0_26 = arith.constant 0 : index
    %42 = vector.load %arg10[%c0_25, %c0_26] : memref<1x128xf32, #tpu.memory_space<vmem>>, vector<1x128xf32>
    %43 = vector.broadcast %42 : vector<1x128xf32> to vector<16x128xf32>
    %44 = arith.addf %41, %43 : vector<16x128xf32>
    %cst_27 = arith.constant 0.000000e+00 : f32
    %45 = vector.broadcast %cst_27 : f32 to vector<16x128xf32>
    %46 = arith.maximumf %44, %45 : vector<16x128xf32>
    %47 = arith.truncf %46 : vector<16x128xf32> to vector<16x128xbf16>
    %c0_28 = arith.constant 0 : index
    %c0_29 = arith.constant 0 : index
    %48 = vector.load %arg11[%c0_28, %c0_29] : memref<128x256xbf16, #tpu.memory_space<vmem>>, vector<128x256xbf16>
    %cst_30 = arith.constant dense<0.000000e+00> : vector<16x256xf32>
    %49 = tpu.matmul %47, %48, %cst_30 {dimension_numbers = #tpu.dot_dimension_numbers<[1], [0], [0], [1], [0, 0, 1, 1], [], []>} : vector<16x128xbf16>, vector<128x256xbf16>, vector<16x256xf32> -> vector<16x256xf32>
    %c0_31 = arith.constant 0 : index
    %c0_32 = arith.constant 0 : index
    %50 = vector.load %arg12[%c0_31, %c0_32] : memref<1x256xf32, #tpu.memory_space<vmem>>, vector<1x256xf32>
    %51 = vector.broadcast %50 : vector<1x256xf32> to vector<16x256xf32>
    %52 = arith.addf %49, %51 : vector<16x256xf32>
    %cst_33 = arith.constant 0.000000e+00 : f32
    %53 = vector.broadcast %cst_33 : f32 to vector<16x256xf32>
    %54 = arith.maximumf %52, %53 : vector<16x256xf32>
    %55 = arith.truncf %54 : vector<16x256xf32> to vector<16x256xbf16>
    %c0_34 = arith.constant 0 : index
    %c0_35 = arith.constant 0 : index
    %56 = vector.load %arg13[%c0_34, %c0_35] : memref<256x128xbf16, #tpu.memory_space<vmem>>, vector<256x128xbf16>
    %cst_36 = arith.constant dense<0.000000e+00> : vector<16x128xf32>
    %57 = tpu.matmul %55, %56, %cst_36 {dimension_numbers = #tpu.dot_dimension_numbers<[1], [0], [0], [1], [0, 0, 1, 1], [], []>} : vector<16x256xbf16>, vector<256x128xbf16>, vector<16x128xf32> -> vector<16x128xf32>
    %c0_37 = arith.constant 0 : index
    %c0_38 = arith.constant 0 : index
    %58 = vector.load %arg14[%c0_37, %c0_38] : memref<1x128xf32, #tpu.memory_space<vmem>>, vector<1x128xf32>
    %59 = vector.broadcast %58 : vector<1x128xf32> to vector<16x128xf32>
    %60 = arith.addf %57, %59 : vector<16x128xf32>
    %cst_39 = arith.constant -1.38629436 : f32
    %61 = vector.broadcast %cst_39 : f32 to vector<16x1xf32>
    %62 = arith.mulf %61, %0 : vector<16x1xf32>
    %63 = math.exp %62 : vector<16x1xf32>
    %cst_40 = arith.constant 1.000000e+00 : f32
    %64 = vector.broadcast %cst_40 : f32 to vector<16x1xf32>
    %65 = arith.subf %63, %64 : vector<16x1xf32>
    %cst_41 = arith.constant -0.72134751 : f32
    %66 = vector.broadcast %cst_41 : f32 to vector<16x1xf32>
    %67 = arith.mulf %65, %66 : vector<16x1xf32>
    %68 = vector.extract_strided_slice %60 {offsets = [0, 0], sizes = [16, 8], strides = [1, 1]} : vector<16x128xf32> to vector<16x8xf32>
    %69 = vector.broadcast %67 : vector<16x1xf32> to vector<16x8xf32>
    %70 = arith.divf %68, %69 : vector<16x8xf32>
    %c0_42 = arith.constant 0 : index
    %c0_43 = arith.constant 0 : index
    %71 = vector.load %arg15[%c0_42, %c0_43] : memref<16x8xf32, #tpu.memory_space<vmem>>, vector<16x8xf32>
    tpu.vector_store %arg15[%c0_42, %c0_43], %70 {strides = array<i32>} : memref<16x8xf32, #tpu.memory_space<vmem>>, vector<16x8xf32>,
    return
  }
  func.func @transform_0(%arg0: i32) -> (i32, i32) {
    %c0_i32 = arith.constant 0 : i32
    %c0_i32_0 = arith.constant 0 : i32
    return %arg0, %c0_i32 : i32, i32
  }
  func.func @transform_1(%arg0: i32) -> (i32, i32) {
    %c0_i32 = arith.constant 0 : i32
    %c0_i32_0 = arith.constant 0 : i32
    return %arg0, %c0_i32 : i32, i32
  }
  func.func @transform_2(%arg0: i32) -> (i32, i32) {
    %c0_i32 = arith.constant 0 : i32
    %c0_i32_0 = arith.constant 0 : i32
    %c0_i32_1 = arith.constant 0 : i32
    return %c0_i32, %c0_i32_0 : i32, i32
  }
  func.func @transform_3(%arg0: i32) -> (i32, i32) {
    %c0_i32 = arith.constant 0 : i32
    %c0_i32_0 = arith.constant 0 : i32
    %c0_i32_1 = arith.constant 0 : i32
    return %c0_i32, %c0_i32_0 : i32, i32
  }
  func.func @transform_4(%arg0: i32) -> (i32, i32) {
    %c0_i32 = arith.constant 0 : i32
    %c0_i32_0 = arith.constant 0 : i32
    %c0_i32_1 = arith.constant 0 : i32
    return %c0_i32, %c0_i32_0 : i32, i32
  }
  func.func @transform_5(%arg0: i32) -> (i32, i32) {
    %c0_i32 = arith.constant 0 : i32
    %c0_i32_0 = arith.constant 0 : i32
    %c0_i32_1 = arith.constant 0 : i32
    return %c0_i32, %c0_i32_0 : i32, i32
  }
  func.func @transform_6(%arg0: i32) -> (i32, i32) {
    %c0_i32 = arith.constant 0 : i32
    %c0_i32_0 = arith.constant 0 : i32
    %c0_i32_1 = arith.constant 0 : i32
    return %c0_i32, %c0_i32_0 : i32, i32
  }
  func.func @transform_7(%arg0: i32) -> (i32, i32) {
    %c0_i32 = arith.constant 0 : i32
    %c0_i32_0 = arith.constant 0 : i32
    %c0_i32_1 = arith.constant 0 : i32
    return %c0_i32, %c0_i32_0 : i32, i32
  }
  func.func @transform_8(%arg0: i32) -> (i32, i32) {
    %c0_i32 = arith.constant 0 : i32
    %c0_i32_0 = arith.constant 0 : i32
    %c0_i32_1 = arith.constant 0 : i32
    return %c0_i32, %c0_i32_0 : i32, i32
  }
  func.func @transform_9(%arg0: i32) -> (i32, i32) {
    %c0_i32 = arith.constant 0 : i32
    %c0_i32_0 = arith.constant 0 : i32
    %c0_i32_1 = arith.constant 0 : i32
    return %c0_i32, %c0_i32_0 : i32, i32
  }
  func.func @transform_10(%arg0: i32) -> (i32, i32) {
    %c0_i32 = arith.constant 0 : i32
    %c0_i32_0 = arith.constant 0 : i32
    %c0_i32_1 = arith.constant 0 : i32
    return %c0_i32, %c0_i32_0 : i32, i32
  }
  func.func @transform_11(%arg0: i32) -> (i32, i32) {
    %c0_i32 = arith.constant 0 : i32
    %c0_i32_0 = arith.constant 0 : i32
    %c0_i32_1 = arith.constant 0 : i32
    return %c0_i32, %c0_i32_0 : i32, i32
  }
  func.func @transform_12(%arg0: i32) -> (i32, i32) {
    %c0_i32 = arith.constant 0 : i32
    %c0_i32_0 = arith.constant 0 : i32
    %c0_i32_1 = arith.constant 0 : i32
    return %c0_i32, %c0_i32_0 : i32, i32
  }
  func.func @transform_13(%arg0: i32) -> (i32, i32) {
    %c0_i32 = arith.constant 0 : i32
    %c0_i32_0 = arith.constant 0 : i32
    %c0_i32_1 = arith.constant 0 : i32
    return %c0_i32, %c0_i32_0 : i32, i32
  }
  func.func @transform_14(%arg0: i32) -> (i32, i32) {
    %c0_i32 = arith.constant 0 : i32
    %c0_i32_0 = arith.constant 0 : i32
    return %arg0, %c0_i32 : i32, i32
  }
}

</mosaic_0001>

<bundles_post_ra>
// kernel: tpu_custom_call.1
= control target key start
LH: loop header
LB: loop body
LE: loop exit
PB: predicated region body
PF: predicated region fallthrough
CT: control target
= control target key end

     0   :  { %19 = vsyncpa [#allocation3], 0  ;;  %s2361_s0 = inlined_call_operand.vmem [shape: f32[32,12], index: 0, kind: input, shape index: {}]   ;;  %s2362_s1 = inlined_call_operand.vmem [shape: f32[32,1], index: 1, kind: input, shape index: {}]   ;;  %s2363_s2 = inlined_call_operand.vmem [shape: bf16[12,128], index: 2, kind: input, shape index: {}]   ;;  %s2364_s3 = inlined_call_operand.vmem [shape: f32[1,128], index: 3, kind: input, shape index: {}]   ;;  %s2365_s4 = inlined_call_operand.vmem [shape: f32[1,128], index: 4, kind: input, shape index: {}]   ;;  %s2366_s5 = inlined_call_operand.vmem [shape: f32[1,128], index: 5, kind: input, shape index: {}]   ;;  %s2367_s6 = inlined_call_operand.vmem [shape: bf16[128,128], index: 6, kind: input, shape index: {}]   ;;  %s2368_s7 = inlined_call_operand.vmem [shape: f32[1,128], index: 7, kind: input, shape index: {}]   ;;  %s2369_s8 = inlined_call_operand.hbm [shape: bf16[256,128], index: 8, kind: input, shape index: {}]   ;;  %s2370_s9 = inlined_call_operand.vmem [shape: f32[1,128], index: 9, kind: input, shape index: {}]   ;;  %s2371_s10 = inlined_call_operand.hbm [shape: bf16[128,256], index: 10, kind: input, shape index: {}]   ;;  %s2372_s11 = inlined_call_operand.vmem [shape: f32[1,256], index: 11, kind: input, shape index: {}]   ;;  %s2373_s12 = inlined_call_operand.hbm [shape: bf16[256,128], index: 12, kind: input, shape index: {}]   ;;  %s2374_s13 = inlined_call_operand.vmem [shape: f32[1,128], index: 13, kind: input, shape index: {}]   ;;  %s2375_s14 = inlined_call_operand.vmem [shape: f32[32,8], index: 14, kind: output, shape index: {}]  }
   0x1   :  { %20 = vsyncpa [#allocation5], 0  ;;  %s2125_s29 = smov 0  }
   0x2 LB: > { %s2034_s30 = smov [#allocation4]   ;;  %s1615_s16 = sadd.s32 4294967295, %s2032_s29   ;;  %s2032_s29 = sphi %s2125_s29, %s26_s29  }
   0x3   : > { %s407_s15 = sshll.u32 %s2034_s30, 4  ;;  %p1617_p0 = scmp.ge.s32.totalorder %s2032_s29, 1  ;;  %s408_s15 = int_to_ptr.vmem [resolvable:$true] %s407_s15 }
   0x4   : > { %p361_p1 = scmp.lt.s32.totalorder %s2032_s29, 3  ;;  %p2135_p2 = scmp.eq.s32.totalorder %s1615_s16, 0 }
   0x5   : > { %s2035_s19 = smov [#allocation2]   ;;  %s2036_s22 = smov [#allocation6]  }
   0x6   : > { %p2139_p3 = pnand %p1617_p0, %p361_p1  ;;  %s391_s20 = sshll.u32 %s2035_s19, 4  ;;  %s2145_s20 = int_to_ptr.vmem [resolvable:$true] %s391_s20 }
   0x7   : > { %s2153_s23 = sshll.u32 %s2036_s22, 4  ;;  %s1951_s24 = scalar_lea.vmem %s408_s15, 2048  ;;  %s424_s23 = int_to_ptr.vmem [resolvable:$true] %s2153_s23 }
   0x8   : > { %p1809_p4 = pneg %p2139_p3  ;;  %p1952_p7 = scmp.ne.s32.totalorder %s408_s15, %s1951_s24 }
   0x9   : > { %p1959_p10 = scmp.lt.s32.totalorder %s408_s15, %s408_s15  ;;  %p1960_p11 = scmp.lt.s32.totalorder %s1951_s24, %s1951_s24 }
   0xa   : > { %p2149_p5 = pnand %p2135_p2, %p1809_p4 }
   0xb   : > { %p1961_p12 = por %p1960_p11, %p1959_p10 }
   0xc   : > { %p1942_p6 = pneg %p2149_p5 }
   0xe   : > { %p1954_p8 = pnand %p1952_p7, %p1942_p6 }
  0x10   : > { %p1955_p9 = pneg %p1954_p8 }
  0x12   : > { %p1962_p13 = pnand %p1961_p12, %p1955_p9 }
  0x14   : > { %1965 = shalt.err (!%p1962_p13)
}
  0x15   : > { %s2037_s25 = smov 128   ;;  %s2038_s26 = smov 8  }
  0x16   : > { %1815 = dma.hbm_to_vmem [thread:$0]  (!%p2149_p5), %s2371_s10, 2048, %s408_s15, [#allocation5], %s2037_s25, %s2037_s25, %s2038_s26  }
  0x17   : > { %s1977_s30 = scalar_lea.vmem %s2145_s20, 2048  ;;  %p1985_p7 = scmp.lt.s32.totalorder %s2145_s20, %s2145_s20 }
  0x18   : > { %p1978_p0 = scmp.ne.s32.totalorder %s2145_s20, %s1977_s30  ;;  %p1986_p8 = scmp.lt.s32.totalorder %s1977_s30, %s1977_s30 }
  0x1a   : > { %p1980_p1 = pnand %p1978_p0, %p1942_p6  ;;  %p1987_p9 = por %p1986_p8, %p1985_p7 }
  0x1c   : > { %p1981_p4 = pneg %p1980_p1 }
  0x1e   : > { %p1988_p10 = pnand %p1987_p9, %p1981_p4 }
  0x20   : > { %1991 = shalt.err (!%p1988_p10)
}
  0x21   : > { %s2039_s19 = smov 64   ;;  %s2040_s22 = smov 4  }
  0x22   : > { %1812 = dma.hbm_to_vmem [thread:$0]  (!%p2149_p5), %s2369_s8, 2048, %s2145_s20, [#allocation3], %s2039_s19, %s2039_s19, %s2040_s22  }
  0x23   : > { %s2003_s25 = scalar_lea.vmem %s424_s23, 2048  ;;  %p2011_p0 = scmp.lt.s32.totalorder %s424_s23, %s424_s23 }
  0x24   : > { %p2004_p11 = scmp.ne.s32.totalorder %s424_s23, %s2003_s25  ;;  %p2012_p1 = scmp.lt.s32.totalorder %s2003_s25, %s2003_s25 }
  0x26   : > { %p2006_p12 = pnand %p2004_p11, %p1942_p6  ;;  %p2013_p4 = por %p2012_p1, %p2011_p0 }
  0x28   : > { %p2007_p13 = pneg %p2006_p12 }
  0x2a   : > { %p2014_p7 = pnand %p2013_p4, %p2007_p13 }
  0x2c   : > { %2017 = shalt.err (!%p2014_p7)
}
  0x2d   : > { %1818 = dma.hbm_to_vmem [thread:$0]  (!%p2149_p5), %s2373_s12, 2048, %s424_s23, [#allocation5], %s2039_s19, %s2039_s19, %s2040_s22  }
  0x2e   : > { %460 = sbr.rel (%p2139_p3) target bundleno = 1127 (0x467), region = 76 }
  0x33   : > { %2023 = dma.done.wait (%p2135_p2), [#allocation3], 2048  }
  0x34   : > { %2025 = vsyncadd (%p2135_p2), [#allocation3], 4294965248 }
  0x35   : > { %2027 = dma.done.wait (%p2135_p2), [#allocation5], 4096  }
  0x36   : > { %2029 = vsyncadd (%p2135_p2), [#allocation5], 4294963200  ;;  %s1626_s20 = sshll.u32 %s1615_s16, 1  ;;  %v2041_v0 = vmov 0   ;;  %v1851_v3 = vld [vmem:[%s2367_s6 + $0x38] sm:$0xff]   ;;  %v2042_v4 = vmov 0.0  }
  0x37   : > { %1849 = vset.pattern.permute.xlu0 %v2041_v0  ;;  %p520_p5 = scmp.lt.s32.totalorder %s1626_s20, 3  ;;  %1850 = vset.pattern.permute.xlu1 %v2041_v0  ;;  %v1852_v7 = vld [vmem:[%s2367_s6 + $0x30] sm:$0xff]   ;;  %v1853_v8 = vld [vmem:[%s2363_s2] sm:$0x3f]   ;;  %vm561_vm0 = vcmask 1045504   ;;  %v1854_v11 = vld [vmem:[%s2367_s6 + $0x28] sm:$0xff]  }
  0x38   : > { %1769 = vmatprep.subr.bf16.mxu1 %v2042_v4  ;;  %1763 = vmatprep.subr.bf16.mxu0 %v2042_v4  ;;  %v563_v9 = vsel %vm561_vm0, %v1853_v8, 0  ;;  %vm2043_vm1 = vmmov 0   ;;  %vm557_vm2 = vcmask 97280   ;;  %v1855_v12 = vld [vmem:[%s2367_s6 + $0x20] sm:$0xff]   ;;  %v1856_v13 = vld [vmem:[%s2367_s6 + $0x18] sm:$0xff]   ;;  %v1857_v14 = vld [vmem:[%s2367_s6 + $0x10] sm:$0xff]  }
  0x39   : > { %s2382_s20 = smov (!%p520_p5, %s1626_s20), 3  ;;  %1770 = vmatpush3.bf16.msra.mxu1 %v1851_v3  ;;  %1764 = vmatpush3.bf16.msra.mxu0 %v563_v9  ;;  %v1858_v15 = vld [vmem:[%s2367_s6 + $0x8] sm:$0xff]   ;;  %v1859_v16 = vld [vmem:[%s2367_s6] sm:$0xff]   ;;  %v2044_v41 = vmov 683565275  }
  0x3a   : > { %s2201_s18 = sshll.u32 %s2382_s20, 3  ;;  %1771 = vmatprep.subr.bf16.mxu1 %v2042_v4  ;;  %1765 = vmatprep.mubr.msk.bf16.mxu0 %vm2043_vm1, %v2042_v4  ;;  %v1635_v17 = vld [vmem:[%s2365_s4] ss:$0 sm:$0xff]  ;;  %v2045_v45 = vmov 2475754826  }
  0x3b   : > { %s529_s28 = scalar_lea.vmem %s2362_s1, %s2201_s18  ;;  %s523_s30 = scalar_lea.vmem %s2361_s0, %s2201_s18  ;;  %1785 = vmatprep.mubr.msk.bf16.mxu1 %vm2043_vm1, %v2042_v4  ;;  %v1636_v18 = vld [vmem:[%s2366_s5] ss:$0 sm:$0xff]  ;;  %v2046_v47 = vmov 2131351028   ;;  %v2047_v49 = vmov 2102212464  }
  0x3c   : > { %v2207_v1 = vld [vmem:[%s529_s28] sm:$0xff]  ;;  %v2210_v2 = vld [vmem:[%s529_s28 + $0x8] sm:$0xff]  ;;  %v2048_v51 = vmov 920167782   ;;  %v2049_v58 = vmov 1326507024   ;;  %s535_s27 = scalar_lea.vmem %s2375_s14, %s2201_s18 }
  0x3d   : > { %619 = vperm.xlu0 %1849, %v2207_v1   ;;  %v540_v5 = vld [vmem:[%s523_s30] sm:$0xff]  ;;  %v541_v6 = vld [vmem:[%s523_s30 + $0x8] sm:$0xff]  ;;  %1772 = vmatpush3.bf16.msra.mxu1 %v1852_v7 }
  0x3e   : > { %v542_v10 = vpack.c.bf16 %v541_v6, %v540_v5  ;;  %1773 = vmatprep.subr.bf16.mxu1 %v2042_v4 }
  0x40   : > { %1766 = vmatmul.mubr.msk.bf16.vlgmr.msra.gmra.mxu0 %vm557_vm2, %v542_v10 }
  0x41   : > { %624 = vperm.xlu0 %1849, %v2210_v2   ;;  %1774 = vmatpush3.bf16.msra.mxu1 %v1854_v11 }
  0x42   : > { %1775 = vmatprep.subr.bf16.mxu1 %v2042_v4 }
  0x45   : > { %1776 = vmatpush3.bf16.msra.mxu1 %v1855_v12 }
  0x46   : > { %1777 = vmatprep.subr.bf16.mxu1 %v2042_v4 }
  0x49   : > { %1778 = vmatpush3.bf16.msra.mxu1 %v1856_v13 }
  0x4a   : > { %1779 = vmatprep.subr.bf16.mxu1 %v2042_v4 }
  0x4d   : > { %1780 = vmatpush3.bf16.msra.mxu1 %v1857_v14 }
  0x4e   : > { %1781 = vmatprep.subr.bf16.mxu1 %v2042_v4 }
  0x51   : > { %1782 = vmatpush3.bf16.msra.mxu1 %v1858_v15 }
  0x52   : > { %1783 = vmatprep.subr.bf16.mxu1 %v2042_v4 }
  0x55   : > { %1784 = vmatpush3.bf16.msra.mxu1 %v1859_v16 }
  0xb8   : > { %v620_v19 = vpop.permute.xlu0 %619 }
  0xb9   : > { %v633_v20 = vmul.f32 %v1635_v17, %v620_v19 }
  0xbb   : > { %v2250_v21 = vadd.f32 %v1636_v18, %v633_v20 }
  0xbc   : > { %v625_v22 = vpop.permute.xlu0 %624 }
  0xbd   : > { %v644_v23 = vand.u32 2147483647, %v2250_v21  ;;  %v647_v24 = vand.u32 2139095040, %v2250_v21  ;;  %v634_v25 = vmul.f32 %v1635_v17, %v625_v22  ;;  %vm646_vm1 = vcmp.lt.s32.totalorder %v2250_v21, 0 }
  0xbf   : > { %v648_v26 = vshrl.u32 %v647_v24, 23  ;;  %v2254_v27 = vadd.f32 %v1636_v18, %v634_v25  ;;  %v651_v28 = vand.u32 8388607, %v644_v23  ;;  %vm2308_vm2 = vcmp.le.f32.partialorder %v644_v23, 0.7853982 }
  0xc1   : > { %v1637_v29 = vadd.s32 4294967169, %v648_v26  ;;  %v751_v30 = vand.u32 2139095040, %v2254_v27  ;;  %v652_v32 = vor.u32 8388608, %v651_v28  ;;  %v748_v34 = vand.u32 2147483647, %v2254_v27 }
  0xc3   : > { %v654_v31 = vadd.s32 1, %v1637_v29  ;;  %v752_v33 = vshrl.u32 %v751_v30, 23  ;;  %v2260_v39 = vshll.u32 %v652_v32, 8  ;;  %v755_v43 = vand.u32 8388607, %v748_v34 }
  0xc5   : > { %vm655_vm3 = vcmp.gt.s32.totalorder %v654_v31, 0  ;;  %v1641_v36 = vadd.s32 4294967169, %v752_v33  ;;  %v756_v12 = vor.u32 8388608, %v755_v43 }
  0xc6   : > { %v656_v35 = vsel %vm655_vm3, %v654_v31, 0  ;;  %vm750_vm3 = vcmp.lt.s32.totalorder %v2254_v27, 0 }
  0xc7   : > { %v657_v37 = vshrl.u32 %v656_v35, 5  ;;  %v658_v38 = vand.u32 31, %v656_v35  ;;  %v758_v44 = vadd.s32 1, %v1641_v36  ;;  %v796_v28 = vshll.u32 %v756_v12, 8 }
  0xc9   : > { %v659_v40 = vsub.s32 32, %v658_v38  ;;  %v661_v42 = vshll.u32 %v2044_v41, %v658_v38  ;;  %v664_v46 = vshll.u32 %v2045_v45, %v658_v38  ;;  %v667_v48 = vshll.u32 %v2046_v47, %v658_v38 }
  0xca   : > { %v670_v50 = vshll.u32 %v2047_v49, %v658_v38  ;;  %v673_v52 = vshll.u32 %v2048_v51, %v658_v38  ;;  %vm676_vm4 = vcmp.lt.s32.totalorder %v657_v37, 1  ;;  %vm678_vm5 = vcmp.lt.s32.totalorder %v657_v37, 3 }
  0xcb   : > { %v662_v53 = vshrl.u32 %v2045_v45, %v659_v40  ;;  %v665_v54 = vshrl.u32 %v2046_v47, %v659_v40  ;;  %v668_v55 = vshrl.u32 %v2047_v49, %v659_v40  ;;  %v660_v56 = vshrl.u32 %v2044_v41, %v659_v40 }
  0xcc   : > { %v671_v57 = vshrl.u32 %v2048_v51, %v659_v40  ;;  %v674_v59 = vshrl.u32 %v2049_v58, %v659_v40  ;;  %vm759_vm6 = vcmp.gt.s32.totalorder %v758_v44, 0  ;;  %vm679_vm7 = vcmp.lt.s32.totalorder %v657_v37, 4 }
  0xcd   : > { %v663_v60 = vor.u32 %v662_v53, %v661_v42  ;;  %v666_v61 = vor.u32 %v665_v54, %v664_v46  ;;  %v669_v62 = vor.u32 %v668_v55, %v667_v48  ;;  %v760_v4 = vsel %vm759_vm6, %v758_v44, 0 }
  0xce   : > { %v672_v63 = vor.u32 %v671_v57, %v670_v50  ;;  %v675_v3 = vor.u32 %v674_v59, %v673_v52  ;;  %vm677_vm8 = vcmp.lt.s32.totalorder %v657_v37, 2  ;;  %v762_v15 = vand.u32 31, %v760_v4 }
  0xcf   : > { %v680_v5 = vsel %vm676_vm4, %v660_v56, %v663_v60  ;;  %v681_v6 = vsel %vm679_vm7, %v669_v62, 2102212464  ;;  %v684_v7 = vsel %vm676_vm4, %v663_v60, %v666_v61  ;;  %v688_v8 = vsel %vm676_vm4, %v666_v61, %v669_v62 }
  0xd0   : > { %v682_v9 = vsel %vm678_vm5, %v666_v61, %v681_v6  ;;  %v685_v10 = vsel %vm679_vm7, %v672_v63, 920167782  ;;  %v689_v11 = vsel %vm679_vm7, %v675_v3, 1326507024  ;;  %v761_v25 = vshrl.u32 %v760_v4, 5 }
  0xd1   : > { %v686_v13 = vsel %vm678_vm5, %v669_v62, %v685_v10  ;;  %v690_v14 = vsel %vm678_vm5, %v672_v63, %v689_v11  ;;  %v683_v16 = vsel %vm677_vm8, %v680_v5, %v682_v9  ;;  %v763_v26 = vsub.s32 32, %v762_v15 }
  0xd2   : > { %v687_v17 = vsel %vm677_vm8, %v684_v7, %v686_v13  ;;  %v691_v18 = vsel %vm677_vm8, %v688_v8, %v690_v14  ;;  %v699_v29 = vmul.u32 %v2260_v39, %v683_v16  ;;  %v765_v30 = vshll.u32 %v2044_v41, %v762_v15 }
  0xd3   : > { %v2273_v19 = vmul.u32.u64.low %v2260_v39, %v691_v18  ;;  %v2274_v20 = vmul.u32.u64.high %v2260_v39, %v691_v18, %v2273_v19  ;;  %v2277_v22 = vmul.u32.u64.low %v2260_v39, %v687_v17  ;;  %v2278_v24 = vmul.u32.u64.high %v2260_v39, %v687_v17, %v2277_v22 }
  0xd4   : > { %v768_v31 = vshll.u32 %v2045_v45, %v762_v15  ;;  %v771_v32 = vshll.u32 %v2046_v47, %v762_v15  ;;  %v766_v33 = vshrl.u32 %v2045_v45, %v763_v26  ;;  %v769_v35 = vshrl.u32 %v2046_v47, %v763_v26 }
  0xd5   : > { %v772_v36 = vshrl.u32 %v2047_v49, %v763_v26  ;;  %v774_v37 = vshll.u32 %v2047_v49, %v762_v15  ;;  %vm701_vm9 = vc.u32 %v2274_v20, %v2277_v22  ;;  %v702_v38 = vadd.s32 1, %v2278_v24 }
  0xd6   : > { %v775_v40 = vshrl.u32 %v2048_v51, %v763_v26  ;;  %v777_v42 = vshll.u32 %v2048_v51, %v762_v15  ;;  %v767_v43 = vor.u32 %v766_v33, %v765_v30  ;;  %v770_v44 = vor.u32 %v769_v35, %v768_v31 }
  0xd7   : > { %v773_v46 = vor.u32 %v772_v36, %v771_v32  ;;  %v778_v48 = vshrl.u32 %v2049_v58, %v763_v26  ;;  %v703_v39 = vsel %vm701_vm9, %v702_v38, %v2278_v24  ;;  %vm780_vm10 = vcmp.lt.s32.totalorder %v761_v25, 1 }
  0xd8   : > { %v776_v50 = vor.u32 %v775_v40, %v774_v37  ;;  %vm783_vm11 = vcmp.lt.s32.totalorder %v761_v25, 4  ;;  %v704_v45 = vadd.s32 %v703_v39, %v699_v29  ;;  %vm782_vm12 = vcmp.lt.s32.totalorder %v761_v25, 3 }
  0xd9   : > { %v779_v47 = vor.u32 %v778_v48, %v777_v42  ;;  %v785_v49 = vsel %vm783_vm11, %v773_v46, 2102212464  ;;  %v764_v52 = vshrl.u32 %v2044_v41, %v763_v26  ;;  %v788_v53 = vsel %vm780_vm10, %v767_v43, %v770_v44 }
  0xda   : > { %v789_v54 = vsel %vm783_vm11, %v776_v50, 920167782  ;;  %v792_v55 = vsel %vm780_vm10, %v770_v44, %v773_v46  ;;  %v705_v56 = vadd.s32 536870912, %v704_v45  ;;  %vm781_vm13 = vcmp.lt.s32.totalorder %v761_v25, 2 }
  0xdb   : > { %v790_v51 = vsel %vm782_vm12, %v773_v46, %v789_v54  ;;  %v793_v57 = vsel %vm783_vm11, %v779_v47, 1326507024  ;;  %v784_v59 = vsel %vm780_vm10, %v764_v52, %v767_v43  ;;  %v786_v58 = vsel %vm782_vm12, %v770_v44, %v785_v49 }
  0xdc   : > { %v791_v60 = vsel %vm781_vm13, %v788_v53, %v790_v51  ;;  %v794_v61 = vsel %vm782_vm12, %v776_v50, %v793_v57  ;;  %v2288_v62 = vshrl.u32 %v705_v56, 30  ;;  %v787_v7 = vsel %vm781_vm13, %v784_v59, %v786_v58 }
  0xdd   : > { %v795_v63 = vsel %vm781_vm13, %v792_v55, %v794_v61  ;;  %v2290_v3 = vmul.u32.u64.low %v796_v28, %v791_v60  ;;  %v2291_v4 = vmul.u32.u64.high %v796_v28, %v791_v60, %v2290_v3  ;;  %v803_v10 = vmul.u32 %v796_v28, %v787_v7  ;;  %v1868_v55 = vld [vmem:[#allocation2 + $0x58] sm:$0xff]  }
  0xde   : > { %v2293_v5 = vmul.u32.u64.low %v796_v28, %v795_v63  ;;  %v2294_v6 = vmul.u32.u64.high %v796_v28, %v795_v63, %v2293_v5  ;;  %v707_v41 = vshll.u32 %v2288_v62, 30  ;;  %v700_v26 = vadd.s32 %v2277_v22, %v2274_v20 }
  0xdf   : > { %v806_v9 = vadd.s32 1, %v2291_v4  ;;  %v730_v60 = vsub.s32 4, %v2288_v62  ;;  %vm749_vm4 = vcmp.le.f32.partialorder %v748_v34, 0.7853982  ;;  %vm736_vm11 = vweird.f32 %v2250_v21 }
  0xe0   : > { %v708_v8 = vsub.s32 %v704_v45, %v707_v41  ;;  %vm805_vm14 = vc.u32 %v2294_v6, %v2290_v3  ;;  %v804_v39 = vadd.s32 %v2290_v3, %v2294_v6  ;;  %vm840_vm12 = vweird.f32 %v2254_v27 }
  0xe1   : > { %v807_v12 = vsel %vm805_vm14, %v806_v9, %v2291_v4  ;;  %v731_v3 = vsel %vm646_vm1, %v730_v60, %v2288_v62  ;;  %v1874_v60 = vld [vmem:[#allocation2 + $0x40] sm:$0xff]   ;;  %vm1513_vm13 = vcmask 64512  }
  0xe2   : > { %v710_v11 = vsub.s32 0, %v708_v8  ;;  %v808_v13 = vadd.s32 %v807_v12, %v803_v10  ;;  %v733_v5 = vsel %vm2308_vm2, 0, %v731_v3  ;;  %v1881_v3 = vld [vmem:[#allocation4 + $0x64] ss:$8 sps:$4 sm:$0xff]  }
  0xe3   : > { %v737_v41 = vadd.s32 3, %v733_v5  ;;  %v1884_v5 = vld [vmem:[#allocation4 + $0x54] ss:$8 sps:$4 sm:$0xff]  }
  0xe4   : > { %v1638_v14 = vmin.u32 %v710_v11, %v708_v8  ;;  %v809_v15 = vadd.s32 536870912, %v808_v13 }
  0xe5   : > { %v738_v11 = vand.u32 3, %v737_v41  ;;  %v1887_v41 = vld [vmem:[#allocation4 + $0x44] ss:$8 sps:$4 sm:$0xff]  }
  0xe6   : > { %v712_v16 = vclz %v1638_v14  ;;  %v810_v17 = vshrl.u32 %v809_v15, 30 }
  0xe7   : > { %vm740_vm5 = vcmp.eq.s32.totalorder %v738_v11, 0  ;;  %vm743_vm6 = vcmp.eq.s32.totalorder %v738_v11, 2  ;;  %vm739_vm7 = vcmp.lt.s32.totalorder %v738_v11, 2 }
  0xe8   : > { %v1639_v18 = vadd.s32 4294967294, %v712_v16  ;;  %v811_v19 = vshll.u32 %v810_v17, 30  ;;  %v834_v63 = vsub.s32 4, %v810_v17 }
  0xea   : > { %vm1640_vm15 = vcmp.lt.s32.totalorder %v1639_v18, 0  ;;  %v812_v25 = vsub.s32 %v808_v13, %v811_v19  ;;  %v835_v6 = vsel %vm750_vm3, %v834_v63, %v810_v17  ;;  %v1876_v63 = vld [vmem:[#allocation4 + $0x70] ss:$8 sps:$4 sm:$0xff]  }
  0xeb   : > { %v715_v24 = vsel %vm1640_vm15, 0, %v1639_v18  ;;  %v837_v7 = vsel %vm749_vm4, 0, %v835_v6  ;;  %v1882_v6 = vld [vmem:[#allocation4 + $0x50] ss:$8 sps:$4 sm:$0xff]  }
  0xec   : > { %v716_v29 = vsub.s32 32, %v715_v24  ;;  %v720_v28 = vsub.s32 4294967266, %v715_v24  ;;  %v814_v30 = vsub.s32 0, %v812_v25  ;;  %v717_v31 = vshll.u32 %v708_v8, %v715_v24 }
  0xed   : > { %v841_v10 = vadd.s32 3, %v837_v7  ;;  %v1885_v7 = vld [vmem:[#allocation4 + $0x40] ss:$8 sps:$4 sm:$0xff]  }
  0xee   : > { %v718_v32 = vshrl.u32 %v700_v26, %v716_v29  ;;  %v721_v33 = vadd.s32 127, %v720_v28  ;;  %v1642_v35 = vmin.u32 %v814_v30, %v812_v25 }
  0xef   : > { %v842_v62 = vand.u32 3, %v841_v10  ;;  %v1645_v10 = vld [vmem:[%s2368_s7] ss:$0 sm:$0xff] }
  0xf0   : > { %v719_v36 = vor.u32 %v718_v32, %v717_v31  ;;  %v722_v37 = vshll.u32 %v721_v33, 23  ;;  %v816_v38 = vclz %v1642_v35  ;;  %v1632_v31 = vld [vmem:[%s2364_s3] ss:$0 sm:$0xff] }
  0xf1   : > { %vm847_vm8 = vcmp.eq.s32.totalorder %v842_v62, 2  ;;  %vm844_vm9 = vcmp.eq.s32.totalorder %v842_v62, 0  ;;  %vm843_vm10 = vcmp.lt.s32.totalorder %v842_v62, 2 }
  0xf2   : > { %v723_v40 = vor.u32 4788187, %v722_v37  ;;  %v1643_v42 = vadd.s32 4294967294, %v816_v38  ;;  %v726_v44 = vcvt.s32.f32 %v719_v36 }
  0xf4   : > { %v724_v43 = vand.u32 2147483647, %v723_v40  ;;  %vm1644_vm0 = vcmp.lt.s32.totalorder %v1643_v42, 0 }
  0xf5   : > { %v819_v48 = vsel %vm1644_vm0, 0, %v1643_v42 }
  0xf6   : > { %v727_v46 = vmul.f32 %v726_v44, %v724_v43  ;;  %v820_v20 = vsub.s32 32, %v819_v48  ;;  %v824_v22 = vsub.s32 4294967266, %v819_v48  ;;  %v821_v45 = vshll.u32 %v812_v25, %v819_v48  ;;  %v1860_v44 = vld [vmem:[#allocation2 + $0x78] sm:$0xff]  }
  0xf7   : > { %1719 = vmatprep.subr.bf16.mxu0 %v1860_v44  ;;  %v1906_v44 = vld [vmem:[#allocation6 + $0x60] sm:$0xff]  }
  0xf8   : > { %v728_v50 = vxor.u32 2147483648, %v727_v46  ;;  %v822_v47 = vshrl.u32 %v804_v39, %v820_v20  ;;  %v825_v49 = vadd.s32 127, %v824_v22  ;;  %v1862_v22 = vld [vmem:[#allocation2 + $0x70] sm:$0xff]  }
  0xfa   : > { %v729_v52 = vsel %vm646_vm1, %v728_v50, %v727_v46  ;;  %v823_v53 = vor.u32 %v822_v47, %v821_v45  ;;  %v826_v54 = vshll.u32 %v825_v49, 23  ;;  %v1863_v50 = vld [vmem:[#allocation2 + $0x30] sm:$0xff]   ;;  %v1864_v49 = vld [vmem:[#allocation2 + $0x68] sm:$0xff]  }
  0xfb   : > { %v732_v56 = vsel %vm2308_vm2, %v2250_v21, %v729_v52  ;;  %v1865_v52 = vld [vmem:[#allocation2 + $0x28] sm:$0xff]  }
  0xfc   : > { %v827_v51 = vor.u32 4788187, %v826_v54  ;;  %v830_v59 = vcvt.s32.f32 %v823_v53  ;;  %1916 = vcosq.f32 %v732_v56  ;;  %v1866_v53 = vld [vmem:[#allocation2 + $0x60] sm:$0xff]  }
  0xfd   : > { %1918 = vsinq.f32 %v732_v56  ;;  %v1867_v54 = vld [vmem:[#allocation2 + $0x20] sm:$0xff]   ;;  %v1869_v56 = vld [vmem:[#allocation2 + $0x18] sm:$0xff]  }
  0xfe   : > { %v828_v57 = vand.u32 2147483647, %v827_v51  ;;  %v1870_v51 = vld [vmem:[#allocation2 + $0x50] sm:$0xff]  }
 0x100   : > { %v831_v58 = vmul.f32 %v830_v59, %v828_v57  ;;  %v599_v32 = vpop.f32.mrf.mxu0  ;;  %v1871_v57 = vld [vmem:[#allocation2 + $0x10] sm:$0xff]   ;;  %v1872_v59 = vld [vmem:[#allocation2 + $0x48] sm:$0xff]  }
 0x101   : > { %v600_v33 = vadd.f32 %v1632_v31, %v599_v32  ;;  %v1891_v32 = vld [vmem:[#allocation4 + $0x20] ss:$8 sps:$4 sm:$0xff]  }
 0x102   : > { %v832_v61 = vxor.u32 2147483648, %v831_v58  ;;  %v1767_v35 = vpop.f32.mrf.mxu0 }
 0x103   : > { %v606_v36 = vmul.f32 0.5, %v600_v33  ;;  %v1894_v35 = vld [vmem:[#allocation4 + $0x10] ss:$8 sps:$4 sm:$0xff]  }
 0x104   : > { %v833_v23 = vsel %vm750_vm3, %v832_v61, %v831_v58  ;;  %v602_v37 = vpop.f32.mrf.mxu0  ;;  %v1873_v58 = vld [vmem:[#allocation2 + $0x8] sm:$0xff]   ;;  %v1875_v61 = vld [vmem:[#allocation2] sm:$0xff]  }
 0x105   : > { %v836_v4 = vsel %vm749_vm4, %v2254_v27, %v833_v23  ;;  %v603_v21 = vadd.f32 %v1632_v31, %v602_v37  ;;  %v1878_v23 = vld [vmem:[#allocation4 + $0x74] ss:$8 sps:$4 sm:$0xff]   ;;  %v1893_v31 = vld [vmem:[#allocation4 + $0x24] ss:$8 sps:$4 sm:$0xff]   ;;  %v1897_v37 = vld [vmem:[#allocation4] ss:$8 sps:$4 sm:$0xff]  }
 0x106   : > { %1920 = vcosq.f32 %v836_v4  ;;  %v1768_v38 = vpop.f32.mrf.mxu0  ;;  %1264 = vmatprep.subr.bf16.mxu1 %v1878_v23  ;;  %v1913_v23 = vld [vmem:[#allocation6 + $0x8] sm:$0xff]  }
 0x107   : > { %1922 = vsinq.f32 %v836_v4  ;;  %v607_v27 = vmul.f32 0.5, %v603_v21  ;;  %v1879_v4 = vld [vmem:[#allocation4 + $0x60] ss:$8 sps:$4 sm:$0xff]   ;;  %v1901_v38 = vld [vmem:[#allocation6 + $0x38] sm:$0xff]  }
 0x108   : > { %1924 = vtanh.f32 %v606_v36  ;;  %v1899_v36 = vld [vmem:[#allocation4 + $0x4] ss:$8 sps:$4 sm:$0xff]  }
 0x109   : > { %v1917_v8 = vpop.eup %1916  ;;  %1926 = vtanh.f32 %v607_v27  ;;  %v1902_v27 = vld [vmem:[#allocation6 + $0x70] sm:$0xff]  }
 0x10a   : > { %v1919_v9 = vpop.eup %1918  ;;  %v744_v13 = vxor.u32 2147483648, %v1917_v8 }
 0x10b   : > { %v741_v12 = vxor.u32 2147483648, %v1919_v9 }
 0x10c   : > { %v745_v15 = vsel %vm743_vm6, %v744_v13, %v1919_v9  ;;  %v1888_v9 = vld [vmem:[#allocation4 + $0x30] ss:$8 sps:$4 sm:$0xff]  }
 0x10d   : > { %v742_v14 = vsel %vm740_vm5, %v1917_v8, %v741_v12  ;;  %v1890_v8 = vld [vmem:[#allocation4 + $0x34] ss:$8 sps:$4 sm:$0xff]  }
 0x10e   : > { %v746_v17 = vsel %vm739_vm7, %v742_v14, %v745_v15 }
 0x10f   : > { %v747_v29 = vsel %vm736_vm11, nan, %v746_v17 }
 0x113   : > { %v1921_v34 = vpop.eup %1920 }
 0x114   : > { %v1923_v16 = vpop.eup %1922  ;;  %v848_v18 = vxor.u32 2147483648, %v1921_v34 }
 0x115   : > { %v845_v19 = vxor.u32 2147483648, %v1923_v16  ;;  %v1925_v40 = vpop.eup %1924 }
 0x116   : > { %v849_v24 = vsel %vm847_vm8, %v848_v18, %v1923_v16  ;;  %v610_v42 = vmul.f32 0.5, %v1925_v40  ;;  %v1927_v46 = vpop.eup %1926  ;;  %v1903_v40 = vld [vmem:[#allocation6 + $0x30] sm:$0xff]  }
 0x117   : > { %v846_v25 = vsel %vm844_vm9, %v1921_v34, %v845_v19  ;;  %v611_v48 = vmul.f32 0.5, %v1927_v46  ;;  %v1907_v46 = vld [vmem:[#allocation6 + $0x20] sm:$0xff]  }
 0x118   : > { %v850_v26 = vsel %vm843_vm10, %v846_v25, %v849_v24  ;;  %v612_v43 = vadd.f32 0.5, %v610_v42  ;;  %v1904_v42 = vld [vmem:[#allocation6 + $0x68] sm:$0xff]  }
 0x119   : > { %v851_v28 = vsel %vm840_vm12, nan, %v850_v26  ;;  %v613_v20 = vadd.f32 0.5, %v611_v48  ;;  %v1909_v48 = vld [vmem:[#allocation6 + $0x18] sm:$0xff]  }
 0x11a   : > { %v852_v30 = vpack.c.bf16 %v851_v28, %v747_v29  ;;  %v2331_v39 = vmul.f32 %v612_v43, %v600_v33  ;;  %v1896_v33 = vld [vmem:[#allocation4 + $0x14] ss:$8 sps:$4 sm:$0xff]   ;;  %v1905_v43 = vld [vmem:[#allocation6 + $0x28] sm:$0xff]  }
 0x11b   : > { %v2333_v45 = vmul.f32 %v613_v20, %v603_v21  ;;  %v1900_v21 = vld [vmem:[#allocation6 + $0x78] sm:$0xff]  }
 0x11c   : > { %1786 = vmatmul.mubr.bf16.vlgmr.msra.gmra.mxu1 %v852_v30 }
 0x11d   : > { %1296 = vmatprep.mubr.bf16.mxu1 %v2041_v0  ;;  %v1861_v0 = vld [vmem:[#allocation2 + $0x38] sm:$0xff]   ;;  %v975_v47 = vpack.c.bf16 %v2333_v45, %v2331_v39  ;;  %1265 = vmatpush1.bf16.msra.mxu1 %v1876_v63  ;;  %v1912_v63 = vld [vmem:[#allocation6 + $0x48] sm:$0xff]  }
 0x11e   : > { %1720 = vmatpush3.bf16.msra.mxu0 %v1861_v0  ;;  %1266 = vmatprep.subr.bf16.mxu1 %v1881_v3  ;;  %v1908_v0 = vld [vmem:[#allocation6 + $0x58] sm:$0xff]  }
 0x11f   : > { %1721 = vmatprep.subr.bf16.mxu0 %v1862_v22 }
 0x121   : > { %1267 = vmatpush1.bf16.msra.mxu1 %v1879_v4 }
 0x122   : > { %1722 = vmatpush3.bf16.msra.mxu0 %v1863_v50  ;;  %1268 = vmatprep.subr.bf16.mxu1 %v1884_v5  ;;  %v1654_v50 = vld [vmem:[%s2370_s9] ss:$0 sm:$0xff] }
 0x123   : > { %1723 = vmatprep.subr.bf16.mxu0 %v1864_v49  ;;  %v1914_v5 = vld [vmem:[#allocation6 + $0x40] sm:$0xff]  }
 0x125   : > { %1269 = vmatpush1.bf16.msra.mxu1 %v1882_v6  ;;  %v1915_v6 = vld [vmem:[#allocation6] sm:$0xff]  }
 0x126   : > { %1724 = vmatpush3.bf16.msra.mxu0 %v1865_v52  ;;  %1270 = vmatprep.subr.bf16.mxu1 %v1887_v41 }
 0x127   : > { %1725 = vmatprep.subr.bf16.mxu0 %v1866_v53 }
 0x129   : > { %1271 = vmatpush1.bf16.msra.mxu1 %v1885_v7 }
 0x12a   : > { %1726 = vmatpush3.bf16.msra.mxu0 %v1867_v54  ;;  %1272 = vmatprep.subr.bf16.mxu1 %v1890_v8  ;;  %v1174_v8 = vlaneseq }
 0x12b   : > { %1727 = vmatprep.subr.bf16.mxu0 %v1868_v55 }
 0x12d   : > { %1273 = vmatpush1.bf16.msra.mxu1 %v1888_v9  ;;  %v1175_v9 = vshrl.u32 %v1174_v8, 7 }
 0x12e   : > { %1728 = vmatpush3.bf16.msra.mxu0 %v1869_v56  ;;  %1274 = vmatprep.subr.bf16.mxu1 %v1893_v31 }
 0x12f   : > { %1729 = vmatprep.subr.bf16.mxu0 %v1870_v51  ;;  %v1489_v51 = vmul.f32 -1.3862944, %v2207_v1 }
 0x131   : > { %1275 = vmatpush1.bf16.msra.mxu1 %v1891_v32 }
 0x132   : > { %1730 = vmatpush3.bf16.msra.mxu0 %v1871_v57  ;;  %1276 = vmatprep.subr.bf16.mxu1 %v1896_v33  ;;  %v1490_v57 = vmul.f32 -1.3862944, %v2210_v2 }
 0x133   : > { %1731 = vmatprep.subr.bf16.mxu0 %v1872_v59  ;;  %v1491_v59 = vmul.f32 1.442695, %v1489_v51 }
 0x135   : > { %1277 = vmatpush1.bf16.msra.mxu1 %v1894_v35 }
 0x136   : > { %1732 = vmatpush3.bf16.msra.mxu0 %v1873_v58  ;;  %1278 = vmatprep.subr.bf16.mxu1 %v1899_v36  ;;  %v1493_v58 = vmul.f32 1.442695, %v1490_v57  ;;  %v1687_v36 = vld [vmem:[%s2374_s13] ss:$0 sm:$0xff] }
 0x137   : > { %1733 = vmatprep.subr.bf16.mxu0 %v1874_v60  ;;  %v1910_v60 = vld [vmem:[#allocation6 + $0x50] sm:$0xff]  }
 0x139   : > { %1279 = vmatpush1.bf16.msra.mxu1 %v1897_v37 }
 0x13a   : > { %1734 = vmatpush3.bf16.msra.mxu0 %v1875_v61  ;;  %v1911_v61 = vld [vmem:[#allocation6 + $0x10] sm:$0xff]  }
 0x13b   : > { %1741 = vmatprep.subr.bf16.mxu0 %v1900_v21 }
 0x1dc   : > { %v958_v11 = vpop.f32.mrf.mxu1 }
 0x1dd   : > { %v959_v12 = vadd.f32 %v1645_v10, %v958_v11  ;;  %v1176_v11 = vsub.s32 0, %v1175_v9 }
 0x1de   : > { %v1787_v13 = vpop.f32.mrf.mxu1 }
 0x1df   : > { %v965_v62 = vmul.f32 0.5, %v959_v12 }
 0x1e0   : > { %v961_v34 = vpop.f32.mrf.mxu1 }
 0x1e1   : > { %1928 = vtanh.f32 %v965_v62  ;;  %v962_v14 = vadd.f32 %v1645_v10, %v961_v34  ;;  %v1180_v10 = vsub.s32 1, %v1175_v9 }
 0x1e2   : > { %v1788_v15 = vpop.f32.mrf.mxu1 }
 0x1e3   : > { %v966_v16 = vmul.f32 0.5, %v962_v14 }
 0x1e5   : > { %1930 = vtanh.f32 %v966_v16 }
 0x1e6   : > { %1932 = vpow2.f32 %v1491_v59 }
 0x1e7   : > { %1934 = vpow2.f32 %v1493_v58 }
 0x1ee   : > { %v1929_v18 = vpop.eup %1928 }
 0x1ef   : > { %v969_v19 = vmul.f32 0.5, %v1929_v18 }
 0x1f1   : > { %v971_v24 = vadd.f32 0.5, %v969_v19 }
 0x1f2   : > { %v1931_v17 = vpop.eup %1930 }
 0x1f3   : > { %v970_v25 = vmul.f32 0.5, %v1931_v17  ;;  %v973_v29 = vmul.f32 %v971_v24, %v959_v12  ;;  %v1933_v3 = vpop.eup %1932  ;;  %v1172_v12 = vld [vmem:[%s2372_s11] sm:$0x3] }
 0x1f4   : > { %v1935_v4 = vpop.eup %1934  ;;  %v1704_v1 = vadd.f32 -1.0, %v1933_v3  ;;  %v1181_v62 = vrot.slane %v1172_v12, %v1180_v10  ;;  %v1177_v34 = vrot.slane %v1172_v12, %v1176_v11 }
 0x1f5   : > { %v972_v26 = vadd.f32 0.5, %v970_v25  ;;  %v1705_v2 = vadd.f32 -1.0, %v1935_v4 }
 0x1f6   : > { %v1497_v41 = vmul.f32 -0.7213475, %v1704_v1 }
 0x1f7   : > { %v974_v28 = vmul.f32 %v972_v26, %v962_v14  ;;  %v1498_v7 = vmul.f32 -0.7213475, %v1705_v2 }
 0x1f8   : > { %1501 = vperm.xlu1 %1850, %v1497_v41  }
 0x1f9   : > { %v976_v30 = vpack.c.bf16 %v974_v28, %v973_v29 }
 0x1fb   : > { %1144 = vmatprep.mubr.bf16.mxu0 %v976_v30 }
 0x1fc   : > { %1145 = vmatmul.mubr.bf16.vlgmr.msra.gmra.mxu0 %v975_v47  ;;  %1506 = vperm.xlu1 %1850, %v1498_v7  }
 0x1fd   : > { %1742 = vmatpush3.bf16.msra.mxu0 %v1901_v38 }
 0x1fe   : > { %1743 = vmatprep.subr.bf16.mxu0 %v1902_v27 }
 0x201   : > { %1744 = vmatpush3.bf16.msra.mxu0 %v1903_v40 }
 0x202   : > { %1745 = vmatprep.subr.bf16.mxu0 %v1904_v42 }
 0x205   : > { %1746 = vmatpush3.bf16.msra.mxu0 %v1905_v43 }
 0x206   : > { %1747 = vmatprep.subr.bf16.mxu0 %v1906_v44 }
 0x209   : > { %1748 = vmatpush3.bf16.msra.mxu0 %v1907_v46 }
 0x20a   : > { %1749 = vmatprep.subr.bf16.mxu0 %v1908_v0 }
 0x20d   : > { %1750 = vmatpush3.bf16.msra.mxu0 %v1909_v48 }
 0x20e   : > { %1751 = vmatprep.subr.bf16.mxu0 %v1910_v60 }
 0x211   : > { %1752 = vmatpush3.bf16.msra.mxu0 %v1911_v61 }
 0x212   : > { %1753 = vmatprep.subr.bf16.mxu0 %v1912_v63 }
 0x215   : > { %1754 = vmatpush3.bf16.msra.mxu0 %v1913_v23 }
 0x216   : > { %1755 = vmatprep.subr.bf16.mxu0 %v1914_v5 }
 0x219   : > { %1756 = vmatpush3.bf16.msra.mxu0 %v1915_v6 }
 0x273   : > { %v1502_v32 = vpop.permute.xlu1 %1501 }
 0x274   : > { %1936 = vrcp.f32 %v1502_v32 }
 0x277   : > { %v1507_v33 = vpop.permute.xlu1 %1506 }
 0x278   : > { %1938 = vrcp.f32 %v1507_v33 }
 0x281   : > { %v1937_v38 = vpop.eup %1936 }
 0x285   : > { %v1939_v0 = vpop.eup %1938 }
 0x2bc   : > { %v1735_v39 = vpop.f32.mrf.mxu0 }
 0x2be   : > { %v1736_v20 = vpop.f32.mrf.mxu0 }
 0x2bf   : > { %v1737_v22 = vadd.f32 %v1736_v20, %v1735_v39 }
 0x2c0   : > { %v1738_v45 = vpop.f32.mrf.mxu0 }
 0x2c1   : > { %v1147_v49 = vadd.f32 %v1737_v22, %v1654_v50 }
 0x2c2   : > { %v1739_v47 = vpop.f32.mrf.mxu0 }
 0x2c3   : > { %v1740_v52 = vadd.f32 %v1739_v47, %v1738_v45  ;;  %v1153_v54 = vmax.f32 %v1147_v49, 0.0 }
 0x2c5   : > { %v1150_v53 = vadd.f32 %v1740_v52, %v1654_v50 }
 0x2c7   : > { %v1154_v55 = vmax.f32 %v1150_v53, 0.0 }
 0x2c9   : > { %v1155_v56 = vpack.c.bf16 %v1154_v55, %v1153_v54 }
 0x2cb   : > { %1297 = vmatmul.mubr.bf16.vlgmr.msra.gmra.mxu1 %v1155_v56 }
 0x38b   : > { %v1298_v13 = vpop.f32.mrf.mxu1 }
 0x38c   : > { %v1299_v19 = vadd.f32 %v1298_v13, %v1177_v34 }
 0x38d   : > { %v1300_v14 = vpop.f32.mrf.mxu1 }
 0x38e   : > { %v1301_v16 = vadd.f32 %v1300_v14, %v1181_v62  ;;  %v1307_v28 = vmax.f32 %v1299_v19, 0.0 }
 0x38f   : > { %v1302_v15 = vpop.f32.mrf.mxu1 }
 0x390   : > { %v1303_v18 = vadd.f32 %v1302_v15, %v1177_v34  ;;  %v1308_v26 = vmax.f32 %v1301_v16, 0.0 }
 0x391   : > { %v1304_v17 = vpop.f32.mrf.mxu1 }
 0x392   : > { %v1305_v24 = vadd.f32 %v1304_v17, %v1181_v62  ;;  %v1309_v25 = vmax.f32 %v1303_v18, 0.0 }
 0x394   : > { %v1310_v29 = vmax.f32 %v1305_v24, 0.0  ;;  %v1311_v31 = vpack.c.bf16 %v1309_v25, %v1307_v28 }
 0x396   : > { %v1312_v30 = vpack.c.bf16 %v1310_v29, %v1308_v26 }
 0x398   : > { %1480 = vmatprep.mubr.bf16.mxu0 %v1312_v30 }
 0x399   : > { %1481 = vmatmul.mubr.bf16.vlgmr.msra.gmra.mxu0 %v1311_v31 }
 0x459   : > { %v1757_v35 = vpop.f32.mrf.mxu0 }
 0x45b   : > { %v1758_v37 = vpop.f32.mrf.mxu0 }
 0x45c   : > { %v1759_v21 = vadd.f32 %v1758_v37, %v1757_v35 }
 0x45d   : > { %v1760_v27 = vpop.f32.mrf.mxu0 }
 0x45e   : > { %v1483_v40 = vadd.f32 %v1759_v21, %v1687_v36 }
 0x45f   : > { %v1761_v42 = vpop.f32.mrf.mxu0 }
 0x460   : > { %v1510_v43 = vmul.f32 %v1937_v38, %v1483_v40  ;;  %v1762_v44 = vadd.f32 %v1761_v42, %v1760_v27 }
 0x462   : > { %1514 = vst.msk [vmem:[%s535_s27] sm:$0xff] %vm1513_vm13, %v1510_v43  ;;  %v1486_v46 = vadd.f32 %v1762_v44, %v1687_v36 }
 0x464   : > { %v1512_v48 = vmul.f32 %v1939_v0, %v1486_v46 }
 0x466   : > { %1515 = vst.msk [vmem:[%s535_s27 + $0x8] sm:$0xff] %vm1513_vm13, %v1512_v48 }
 0x467 PF: > { %s26_s29 = sadd.s32 1, %s2032_s29  }
 0x468   : > { %p23_p2 = scmp.ge.s32.totalorder %s26_s29, 4  }
 0x46a   :  { %25 = sbr.rel (!%p23_p2) target bundleno = 2 (0x2), region = 122 }
 0x46f   :  { %1538 = vsyncpa [#allocation3], 1 }
 0x470   :  { %1540 = vsyncpa [#allocation3 + $0x1], 1 }
 0x471   :  { %1541 = vsyncpa [#allocation5], 1 }

</bundles_post_ra>
